<compile_context>
chip_gen: v6e
topology: v6e:2x2x1
jax: 0.10.0
libtpu: 0.0.40
codegen_flags: <defaults>
</compile_context>

<pallas_src>
import functools

import jax
import jax.numpy as jnp
from jax.experimental import pallas as pl
from jax.experimental.pallas import tpu as pltpu

HIDDEN = 64
SUBLANE = 8


def _round_up(n, m):
    return ((n + m - 1) // m) * m


def critic_kernel(x_ref, w1_ref, b1_ref, w2_ref, b2_ref, o_ref):
    # x_ref : [TILE_B, in_dim]   (caller dtype; cast to matmul dtype in-kernel)
    # w1_ref: [in_dim, 64]       (matmul dtype, VMEM-resident)
    # b1_ref: [1, 64]            (f32, VMEM-resident)
    # w2_ref: [64, out_dim]      (matmul dtype, narrow, VMEM-resident)
    # b2_ref: [1, out_dim]       (f32, VMEM-resident)
    # o_ref : [TILE_B, out_dim]  (f32, narrow -> minimal HBM writeback)
    x = x_ref[...].astype(w1_ref.dtype)
    # hidden = relu(x @ W1 + b1) -- MXU matmul, f32 accumulate, f32 VPU epilogue.
    h = jnp.dot(x, w1_ref[...], preferred_element_type=jnp.float32)
    h = jnp.maximum(h + b1_ref[...], 0.0)
    # Q = hidden @ W2 + b2 -- narrow-N matmul; kernel is HBM-bound, MXU has slack.
    q = jnp.dot(h.astype(w2_ref.dtype), w2_ref[...],
                preferred_element_type=jnp.float32)
    o_ref[...] = (q + b2_ref[...]).astype(o_ref.dtype)


@functools.partial(jax.jit, static_argnames=("tile_b", "matmul_dtype"))
def critic_forward(x, w1, b1, w2, b2, *, tile_b=4096, matmul_dtype=jnp.bfloat16):
    """x: [B, in], w1: [in, 64], b1: [1, 64], w2: [64, out], b2: [1, out] -> [B, out].

    x may be f32 or bf16 (bf16 halves the dominant HBM input stream).  Use
    matmul_dtype=jnp.float32 for an exact match to the f32 reference.
    """
    B, in_dim = x.shape
    hidden, out_dim = w2.shape

    # Pre-cast weights once for the MXU; biases stay f32 for the VPU epilogue.
    w1c = w1.astype(matmul_dtype)
    w2c = w2.astype(matmul_dtype)
    b1f = b1.astype(jnp.float32)
    b2f = b2.astype(jnp.float32)

    # --- batch tiling ----------------------------------------------------------
    # Multiple of 8 sublanes; no wrapper-side padding of x (Pallas masks the
    # ragged last block).  Cap the tile at ceil(B/2) once the batch is non-trivial
    # so the grid always has >=2 steps for megacore sharding on v7x.
    tb = min(tile_b, _round_up(B, SUBLANE))
    if B > 2 * SUBLANE:
        tb = min(tb, _round_up(-(-B // 2), SUBLANE))
    tb = max(SUBLANE, _round_up(tb, SUBLANE))
    grid = (pl.cdiv(B, tb),)

    itemsize = lambda a: jnp.dtype(a.dtype).itemsize
    cost = pl.CostEstimate(
        flops=2 * B * (in_dim * hidden + hidden * out_dim),
        transcendentals=0,
        bytes_accessed=(x.size * itemsize(x)
                        + w1c.size * itemsize(w1c) + w2c.size * itemsize(w2c)
                        + b1f.size * 4 + b2f.size * 4
                        + B * out_dim * 4),
    )

    out = pl.pallas_call(
        critic_kernel,
        out_shape=jax.ShapeDtypeStruct((B, out_dim), jnp.float32),
        grid_spec=pltpu.PrefetchScalarGridSpec(
            num_scalar_prefetch=0,
            grid=grid,
            in_specs=[
                pl.BlockSpec((tb, in_dim), lambda i: (i, 0)),        # x: streamed
                pl.BlockSpec((in_dim, hidden), lambda i: (0, 0)),    # w1: resident
                pl.BlockSpec((1, hidden), lambda i: (0, 0)),         # b1: resident
                pl.BlockSpec((hidden, out_dim), lambda i: (0, 0)),   # w2: resident
                pl.BlockSpec((1, out_dim), lambda i: (0, 0)),        # b2: resident
            ],
            out_specs=pl.BlockSpec((tb, out_dim), lambda i: (i, 0)),
        ),
        compiler_params=pltpu.CompilerParams(
            dimension_semantics=("parallel",),      # megacore sharding on v7x
            vmem_limit_bytes=32 * 1024 * 1024,      # headroom for tile_b sweeps
        ),
        cost_estimate=cost,
    )(x, w1c, b1f, w2c, b2f)

    return out  # exactly (B, out_dim); no padded slab, no trailing slice pass


def init_critic_params(key, input_dim, output_dim, hidden=HIDDEN):
    """Matches the PyTorch module init: weights ~ N(0, 0.1); biases are the
    nn.Linear default U(-1/sqrt(fan_in), +1/sqrt(fan_in))."""
    k1, k2, k3, k4 = jax.random.split(key, 4)
    # PyTorch stores weight as [out, in]; we keep [in, out] so the kernel does x @ W.
    w1 = (0.1 * jax.random.normal(k1, (input_dim, hidden))).astype(jnp.float32)
    w2 = (0.1 * jax.random.normal(k2, (hidden, output_dim))).astype(jnp.float32)
    bound1 = 1.0 / jnp.sqrt(input_dim)
    bound2 = 1.0 / jnp.sqrt(hidden)
    b1 = jax.random.uniform(k3, (1, hidden), minval=-bound1, maxval=bound1).astype(jnp.float32)
    b2 = jax.random.uniform(k4, (1, output_dim), minval=-bound2, maxval=bound2).astype(jnp.float32)
    return w1, b1, w2, b2


if __name__ == "__main__":
    key = jax.random.PRNGKey(0)
    k_x, k_x2, k_p = jax.random.split(key, 3)

    batch, input_dim, output_dim = 8, 32, 4
    x = jax.random.normal(k_x, (batch, input_dim), dtype=jnp.float32)
    w1, b1, w2, b2 = init_critic_params(k_p, input_dim, output_dim)

    ref = jnp.maximum(x @ w1 + b1, 0.0) @ w2 + b2

    # f32 MXU path: exact match to the reference.
    q_f32 = critic_forward(x, w1, b1, w2, b2, matmul_dtype=jnp.float32)
    jax.block_until_ready(q_f32)
    assert q_f32.shape == (batch, output_dim)
    assert jnp.allclose(q_f32, ref, atol=1e-5, rtol=1e-5)

    # Default bf16-operand / f32-accumulate path: loosened tolerance.
    q_bf16 = critic_forward(x, w1, b1, w2, b2)
    jax.block_until_ready(q_bf16)
    assert q_bf16.shape == (batch, output_dim)
    assert jnp.allclose(q_bf16, ref, atol=5e-2, rtol=5e-2)

    # Ragged batch with an explicit small tile: multi-step grid + masked last block
    # (no wrapper-side padding of x, narrow output written directly).
    B2 = 300
    x2 = jax.random.normal(k_x2, (B2, input_dim), dtype=jnp.float32)
    ref2 = jnp.maximum(x2 @ w1 + b1, 0.0) @ w2 + b2
    q2 = critic_forward(x2, w1, b1, w2, b2, tile_b=128)
    jax.block_until_ready(q2)
    assert q2.shape == (B2, output_dim)
    assert jnp.allclose(q2, ref2, atol=5e-2, rtol=5e-2)

    # Default tile path on the same ragged batch: the ceil(B/2) cap yields a
    # 2-step grid (one tile per TensorCore on v7x).
    q3 = critic_forward(x2, w1, b1, w2, b2)
    jax.block_until_ready(q3)
    assert q3.shape == (B2, output_dim)
    assert jnp.allclose(q3, ref2, atol=5e-2, rtol=5e-2)

    print("KERNEL_OK")
</pallas_src>

<mosaic_0001>
module attributes {stable_mosaic.version = 11 : i64} {
  func.func @critic_kernel(%arg0: i32, %arg1: memref<8x32xf32, #tpu.memory_space<vmem>>, %arg2: memref<32x64xf32, #tpu.memory_space<vmem>>, %arg3: memref<1x64xf32, #tpu.memory_space<vmem>>, %arg4: memref<64x4xf32, #tpu.memory_space<vmem>>, %arg5: memref<1x4xf32, #tpu.memory_space<vmem>>, %arg6: memref<8x4xf32, #tpu.memory_space<vmem>>) attributes {dimension_semantics = [#tpu.dimension_semantics<parallel>], iteration_bounds = array<i64: 1>, scalar_prefetch = 0 : i64, scratch_operands = 0 : i64, tpu.core_type = #tpu.core_type<tc>, window_params = [{transform_indices = @transform_0, window_bounds = array<i64: 8, 32>}, {pipeline_mode = #tpu.pipeline_mode<synchronous>, transform_indices = @transform_1, window_bounds = array<i64: 32, 64>}, {pipeline_mode = #tpu.pipeline_mode<synchronous>, transform_indices = @transform_2, window_bounds = array<i64: 1, 64>}, {pipeline_mode = #tpu.pipeline_mode<synchronous>, transform_indices = @transform_3, window_bounds = array<i64: 64, 4>}, {pipeline_mode = #tpu.pipeline_mode<synchronous>, transform_indices = @transform_4, window_bounds = array<i64: 1, 4>}, {transform_indices = @transform_5, window_bounds = array<i64: 8, 4>}]} {
    %c0 = arith.constant 0 : index
    %c0_0 = arith.constant 0 : index
    %0 = vector.load %arg1[%c0, %c0_0] : memref<8x32xf32, #tpu.memory_space<vmem>>, vector<8x32xf32>
    %c0_1 = arith.constant 0 : index
    %c0_2 = arith.constant 0 : index
    %1 = vector.load %arg2[%c0_1, %c0_2] : memref<32x64xf32, #tpu.memory_space<vmem>>, vector<32x64xf32>
    %cst = arith.constant dense<0.000000e+00> : vector<8x64xf32>
    %2 = tpu.matmul %0, %1, %cst {dimension_numbers = #tpu.dot_dimension_numbers<[1], [0], [0], [1], [0, 0, 1, 1], [], []>} : vector<8x32xf32>, vector<32x64xf32>, vector<8x64xf32> -> vector<8x64xf32>
    %c0_3 = arith.constant 0 : index
    %c0_4 = arith.constant 0 : index
    %3 = vector.load %arg3[%c0_3, %c0_4] : memref<1x64xf32, #tpu.memory_space<vmem>>, vector<1x64xf32>
    %4 = vector.broadcast %3 : vector<1x64xf32> to vector<8x64xf32>
    %5 = arith.addf %2, %4 : vector<8x64xf32>
    %cst_5 = arith.constant 0.000000e+00 : f32
    %6 = vector.broadcast %cst_5 : f32 to vector<8x64xf32>
    %7 = arith.maximumf %5, %6 : vector<8x64xf32>
    %c0_6 = arith.constant 0 : index
    %c0_7 = arith.constant 0 : index
    %8 = vector.load %arg4[%c0_6, %c0_7] : memref<64x4xf32, #tpu.memory_space<vmem>>, vector<64x4xf32>
    %cst_8 = arith.constant dense<0.000000e+00> : vector<8x4xf32>
    %9 = tpu.matmul %7, %8, %cst_8 {dimension_numbers = #tpu.dot_dimension_numbers<[1], [0], [0], [1], [0, 0, 1, 1], [], []>} : vector<8x64xf32>, vector<64x4xf32>, vector<8x4xf32> -> vector<8x4xf32>
    %c0_9 = arith.constant 0 : index
    %c0_10 = arith.constant 0 : index
    %10 = vector.load %arg5[%c0_9, %c0_10] : memref<1x4xf32, #tpu.memory_space<vmem>>, vector<1x4xf32>
    %11 = vector.broadcast %10 : vector<1x4xf32> to vector<8x4xf32>
    %12 = arith.addf %9, %11 : vector<8x4xf32>
    %c0_11 = arith.constant 0 : index
    %c0_12 = arith.constant 0 : index
    %13 = vector.load %arg6[%c0_11, %c0_12] : memref<8x4xf32, #tpu.memory_space<vmem>>, vector<8x4xf32>
    tpu.vector_store %arg6[%c0_11, %c0_12], %12 {strides = array<i32>} : memref<8x4xf32, #tpu.memory_space<vmem>>, vector<8x4xf32>,
    return
  }
  func.func @transform_0(%arg0: i32) -> (i32, i32) {
    %c0_i32 = arith.constant 0 : i32
    %c0_i32_0 = arith.constant 0 : i32
    return %arg0, %c0_i32 : i32, i32
  }
  func.func @transform_1(%arg0: i32) -> (i32, i32) {
    %c0_i32 = arith.constant 0 : i32
    %c0_i32_0 = arith.constant 0 : i32
    %c0_i32_1 = arith.constant 0 : i32
    return %c0_i32, %c0_i32_0 : i32, i32
  }
  func.func @transform_2(%arg0: i32) -> (i32, i32) {
    %c0_i32 = arith.constant 0 : i32
    %c0_i32_0 = arith.constant 0 : i32
    %c0_i32_1 = arith.constant 0 : i32
    return %c0_i32, %c0_i32_0 : i32, i32
  }
  func.func @transform_3(%arg0: i32) -> (i32, i32) {
    %c0_i32 = arith.constant 0 : i32
    %c0_i32_0 = arith.constant 0 : i32
    %c0_i32_1 = arith.constant 0 : i32
    return %c0_i32, %c0_i32_0 : i32, i32
  }
  func.func @transform_4(%arg0: i32) -> (i32, i32) {
    %c0_i32 = arith.constant 0 : i32
    %c0_i32_0 = arith.constant 0 : i32
    %c0_i32_1 = arith.constant 0 : i32
    return %c0_i32, %c0_i32_0 : i32, i32
  }
  func.func @transform_5(%arg0: i32) -> (i32, i32) {
    %c0_i32 = arith.constant 0 : i32
    %c0_i32_0 = arith.constant 0 : i32
    return %arg0, %c0_i32 : i32, i32
  }
}

</mosaic_0001>

<bundles_post_ra>
// kernel: critic_forward.1
= control target key start
LH: loop header
LB: loop body
LE: loop exit
PB: predicated region body
PF: predicated region fallthrough
CT: control target
= control target key end

     0   :  { %v252_v0 = vmov 0.0   ;;  %vm253_vm0 = vmmov 0   ;;  %vm32_vm1 = vcmask 261120   ;;  %vm122_vm2 = vcmask 523264   ;;  %s334_s1 = inlined_call_operand.vmem [shape: f32[32,64], index: 1, kind: input, shape index: {}]   ;;  %s335_s3 = inlined_call_operand.vmem [shape: f32[64,4], index: 3, kind: input, shape index: {}]   ;;  %s336_s0 = inlined_call_operand.vmem [shape: f32[8,32], index: 0, kind: input, shape index: {}]   ;;  %s337_s2 = inlined_call_operand.vmem [shape: f32[1,64], index: 2, kind: input, shape index: {}]   ;;  %s338_s4 = inlined_call_operand.vmem [shape: f32[1,4], index: 4, kind: input, shape index: {}]   ;;  %s339_s5 = inlined_call_operand.vmem [shape: f32[8,4], index: 5, kind: output, shape index: {}]  }
   0x1   :  { %220 = vmatprep.subr.mxu0 %v252_v0  ;;  %v24_v1 = vld [vmem:[%s334_s1 + $0x18] sm:$0xff]  ;;  %v23_v2 = vld [vmem:[%s334_s1 + $0x10] sm:$0xff]  ;;  %228 = vmatprep.mubr.msk.f32.mxu0 %vm253_vm0, %v252_v0  ;;  %v22_v4 = vld [vmem:[%s334_s1 + $0x8] sm:$0xff]  ;;  %vm196_vm3 = vcmask 31744  }
   0x2   :  { %221 = vmatpush3.msra.mxu0 %v24_v1  ;;  %231 = vmatprep.subr.mxu1 %v252_v0  ;;  %v114_v3 = vld [vmem:[%s335_s3 + $0x38] sm:$0xff]  ;;  %v113_v5 = vld [vmem:[%s335_s3 + $0x30] sm:$0xff]  ;;  %v112_v6 = vld [vmem:[%s335_s3 + $0x28] sm:$0xff] }
   0x3   :  { %222 = vmatprep.subr.mxu0 %v252_v0  ;;  %232 = vmatpush3.msra.mxu1 %v114_v3  ;;  %v21_v7 = vld [vmem:[%s334_s1] sm:$0xff]  ;;  %v110_v10 = vld [vmem:[%s335_s3 + $0x18] sm:$0xff]  ;;  %v109_v11 = vld [vmem:[%s335_s3 + $0x10] sm:$0xff] }
   0x4   :  { %223 = vmatpush3.msra.mxu0 %v23_v2  ;;  %233 = vmatprep.subr.mxu1 %v252_v0  ;;  %v20_v8 = vld [vmem:[%s336_s0] sm:$0xff]  ;;  %v108_v12 = vld [vmem:[%s335_s3 + $0x8] sm:$0xff] }
   0x5   :  { %224 = vmatprep.subr.mxu0 %v252_v0  ;;  %234 = vmatpush3.msra.mxu1 %v113_v5  ;;  %v111_v9 = vld [vmem:[%s335_s3 + $0x20] sm:$0xff] }
   0x6   :  { %225 = vmatpush3.msra.mxu0 %v22_v4  ;;  %235 = vmatprep.subr.mxu1 %v252_v0  ;;  %v107_v13 = vld [vmem:[%s335_s3] sm:$0xff] }
   0x7   :  { %226 = vmatprep.subr.mxu0 %v252_v0  ;;  %236 = vmatpush3.msra.mxu1 %v112_v6  ;;  %v202_v14 = vld [vmem:[%s337_s2] ss:$0 sm:$0xff] }
   0x8   :  { %227 = vmatpush3.msra.mxu0 %v21_v7  ;;  %237 = vmatprep.subr.mxu1 %v252_v0  ;;  %v204_v19 = vld [vmem:[%s338_s4] ss:$0 sm:$0xff] }
   0x9   :  { %229 = vmatmul.mubr.msk.f32.vlgmr.msra.gmra.mxu0 %vm32_vm1, %v20_v8  ;;  %238 = vmatpush3.msra.mxu1 %v111_v9 }
   0xa   :  { %239 = vmatprep.subr.mxu1 %v252_v0  ;;  %247 = vmatprep.mubr.msk.f32.mxu1 %vm253_vm0, %v252_v0 }
   0xb   :  { %240 = vmatpush3.msra.mxu1 %v110_v10 }
   0xc   :  { %241 = vmatprep.subr.mxu1 %v252_v0 }
   0xd   :  { %242 = vmatpush3.msra.mxu1 %v109_v11 }
   0xe   :  { %243 = vmatprep.subr.mxu1 %v252_v0 }
   0xf   :  { %244 = vmatpush3.msra.mxu1 %v108_v12 }
  0x10   :  { %245 = vmatprep.subr.mxu1 %v252_v0 }
  0x11   :  { %246 = vmatpush3.msra.mxu1 %v107_v13 }
  0xc9   :  { %v102_v15 = vpop.f32.mrf.mxu0 }
  0xca   :  { %v103_v16 = vadd.f32 %v202_v14, %v102_v15 }
  0xcb   :  { %v230_v17 = vpop.f32.mrf.mxu0 }
  0xcc   :  { %v106_v18 = vmax.f32 %v103_v16, 0.0 }
  0xce   :  { %248 = vmatmul.mubr.msk.f32.vlgmr.msra.gmra.mxu1 %vm122_vm2, %v106_v18 }
 0x18e   :  { %v192_v20 = vpop.f32.mrf.mxu1 }
 0x18f   :  { %v193_v21 = vadd.f32 %v204_v19, %v192_v20 }
 0x190   :  { %v249_v22 = vpop.f32.mrf.mxu1 }
 0x191   :  { %197 = vst.msk [vmem:[%s339_s5] sm:$0xff] %vm196_vm3, %v193_v21 }

</bundles_post_ra>
